<compile_context>
chip_gen: v5e
topology: v5e:2x2
jax: 0.10.0
libtpu: 0.0.40
codegen_flags: <defaults>
</compile_context>

<pallas_src>
import functools

import jax
import jax.numpy as jnp
from jax import lax
from jax.experimental import pallas as pl
from jax.experimental.pallas import tpu as pltpu


_VMEM_LIMIT = 48 * 1024 * 1024


# ----------------------------------------------------------------------------
# Kernel A: ActNorm apply (scale/shift) + InvertibleConv (channel matmul),
# tiled over M = N*H*W rows.
# ----------------------------------------------------------------------------
def actnorm_invconv_kernel(x_ref, s_ref, m_ref, wT_ref, y_ref):
    xn = (x_ref[...] - m_ref[...]) * s_ref[...]          # s * (x + b), b = -mean
    y_ref[...] = jnp.dot(xn, wT_ref[...], preferred_element_type=jnp.float32)


def actnorm_invconv(x2d, s_row, mean_row, w_T, m_tile=1024):
    M, C = x2d.shape
    tm = max(8, (min(m_tile, M) // 8) * 8)
    return pl.pallas_call(
        actnorm_invconv_kernel,
        grid=(pl.cdiv(M, tm),),
        in_specs=[
            pl.BlockSpec((tm, C), lambda i: (i, 0)),
            pl.BlockSpec((1, C), lambda i: (0, 0)),
            pl.BlockSpec((1, C), lambda i: (0, 0)),
            pl.BlockSpec((C, C), lambda i: (0, 0)),
        ],
        out_specs=pl.BlockSpec((tm, C), lambda i: (i, 0)),
        out_shape=jax.ShapeDtypeStruct((M, C), jnp.float32),
        compiler_params=pltpu.CompilerParams(
            dimension_semantics=("parallel",),
            vmem_limit_bytes=_VMEM_LIMIT),
    )(x2d, s_row, mean_row, w_T)


# ----------------------------------------------------------------------------
# Kernel BC: fused AffineCoupling neural net, one image per grid step.
#   conv3x3 + ReLU + conv1x1 + ReLU + ZeroConv2d(3x3, pad value 1) * exp(3s)
#   + residual, written as one dense (HW, C) output block.
# ----------------------------------------------------------------------------
def coupling_kernel(cols1_ref, w1_ref, b1_ref, w2_ref, b2_ref,
                    w3_ref, b3_ref, sc_ref, y_ref, out_ref, h2pad_ref,
                    *, H, W):
    HW = H * W
    F = w1_ref.shape[1]

    # Head: bf16 MXU operands, f32 accumulation.
    h1 = jnp.dot(cols1_ref[0], w1_ref[...],
                 preferred_element_type=jnp.float32) + b1_ref[...]
    h1 = jnp.maximum(h1, 0.0).astype(jnp.bfloat16)
    h2 = jnp.dot(h1, w2_ref[...],
                 preferred_element_type=jnp.float32) + b2_ref[...]
    h2 = jnp.maximum(h2, 0.0)

    # ZeroConv2d pads its input with constant 1.0: build padded h2 in VMEM.
    # Re-initialize the border every step (with "parallel" megacore sharding
    # each core owns its own scratch, so no cross-step init is assumed).
    h2pad_ref[...] = jnp.ones_like(h2pad_ref)
    h2pad_ref[1:H + 1, 1:W + 1, :] = h2.astype(h2pad_ref.dtype).reshape(H, W, F)

    # Tail 3x3 conv as 9 shifted matmuls straight from the padded VMEM tile
    # (no 9x im2col in HBM).  w3 is pre-padded to output width C so the final
    # store is a single dense full-width store of (x_a | x_b + net).
    C = out_ref.shape[-1]
    acc = jnp.zeros((HW, C), jnp.float32)
    for dy in range(3):
        for dx in range(3):
            tap = h2pad_ref[dy:dy + H, dx:dx + W, :].reshape(HW, F)
            acc = acc + jnp.dot(tap, w3_ref[dy * 3 + dx],
                                preferred_element_type=jnp.float32)
    net = (acc + b3_ref[...]) * jnp.exp(sc_ref[...] * 3.0)
    out_ref[0] = y_ref[0] + net


def coupling_net(cols1, w1col, b1_row, w2mat, b2_row, w3taps, b3_row, sc_row,
                 y3, H, W):
    N, HW, K1 = cols1.shape
    F = w1col.shape[1]
    C = y3.shape[-1]
    kernel = functools.partial(coupling_kernel, H=H, W=W)
    return pl.pallas_call(
        kernel,
        grid=(N,),
        in_specs=[
            pl.BlockSpec((1, HW, K1), lambda n: (n, 0, 0)),   # im2col(x_a) tile
            pl.BlockSpec((K1, F), lambda n: (0, 0)),          # w1 (resident)
            pl.BlockSpec((1, F), lambda n: (0, 0)),           # b1
            pl.BlockSpec((F, F), lambda n: (0, 0)),           # w2 (resident)
            pl.BlockSpec((1, F), lambda n: (0, 0)),           # b2
            pl.BlockSpec((9, F, C), lambda n: (0, 0, 0)),     # w3 taps (resident)
            pl.BlockSpec((1, C), lambda n: (0, 0)),           # b3 (padded to C)
            pl.BlockSpec((1, C), lambda n: (0, 0)),           # scale (padded to C)
            pl.BlockSpec((1, HW, C), lambda n: (n, 0, 0)),    # y (x_a | x_b)
        ],
        out_specs=pl.BlockSpec((1, HW, C), lambda n: (n, 0, 0)),
        out_shape=jax.ShapeDtypeStruct((N, HW, C), jnp.float32),
        scratch_shapes=[pltpu.VMEM((H + 2, W + 2, F), jnp.bfloat16)],
        compiler_params=pltpu.CompilerParams(
            dimension_semantics=("parallel",),
            vmem_limit_bytes=_VMEM_LIMIT),
    )(cols1, w1col, b1_row, w2mat, b2_row, w3taps, b3_row, sc_row, y3)


# ----------------------------------------------------------------------------
# Glue
# ----------------------------------------------------------------------------
def im2col3x3(xpad, H, W):
    """xpad: (N, H+2, W+2, Cc) -> (N, H*W, 9*Cc); tap order (dy,dx) major."""
    taps = [xpad[:, dy:dy + H, dx:dx + W, :] for dy in range(3) for dx in range(3)]
    cols = jnp.concatenate(taps, axis=-1)
    return cols.reshape(cols.shape[0], H * W, cols.shape[-1])


def make_params(C, F, key):
    kw, kc1, kc2 = jax.random.split(key, 3)
    Cin = C // 2

    # ---- InvertibleConv parameters (QR -> LU parametrization, as in torch) ----
    w0 = jax.random.normal(kw, (C, C), jnp.float32)
    q, _ = jnp.linalg.qr(w0)
    P, L, U = jax.scipy.linalg.lu(q)
    S_diag = jnp.diag(U)
    U_triu = jnp.triu(U, 1)
    S_sign = jnp.sign(S_diag)
    S_log = jnp.log(jnp.abs(S_diag))
    U_mask = jnp.triu(jnp.ones((C, C), jnp.float32), 1)
    L_mask = U_mask.T
    L_eye = jnp.eye(C, dtype=jnp.float32)
    w_inv = P @ (L * L_mask + L_eye) @ (U_triu * U_mask + jnp.diag(S_sign * jnp.exp(S_log)))

    # ---- AffineCoupling conv parameters (torch OIHW layout) ----
    w1 = 0.05 * jax.random.normal(kc1, (F, Cin, 3, 3), jnp.float32)
    b1 = jnp.zeros((F,), jnp.float32)
    w2 = 0.05 * jax.random.normal(kc2, (F, F, 1, 1), jnp.float32)
    b2 = jnp.zeros((F,), jnp.float32)
    # ZeroConv2d: zero weight, zero bias, zero scale
    w3 = jnp.zeros((Cin, F, 3, 3), jnp.float32)
    b3 = jnp.zeros((Cin,), jnp.float32)
    scale3 = jnp.zeros((Cin,), jnp.float32)

    # matmul-friendly / kernel-resident forms
    w1col = jnp.transpose(w1, (2, 3, 1, 0)).reshape(9 * Cin, F)
    w2mat = w2[:, :, 0, 0].T
    w3taps = jnp.transpose(w3, (2, 3, 1, 0)).reshape(9, F, Cin)
    # pad tail-output width Cin -> C so the fused kernel writes one dense block
    w3taps_full = jnp.concatenate(
        [jnp.zeros((9, F, Cin), jnp.float32), w3taps], axis=-1)       # (9,F,C)
    b3_full = jnp.concatenate([jnp.zeros((Cin,), jnp.float32), b3]).reshape(1, C)
    scale3_full = jnp.concatenate([jnp.zeros((Cin,), jnp.float32), scale3]).reshape(1, C)

    return dict(
        w_inv=w_inv, w_inv_T=w_inv.T, S_log=S_log,
        w1=w1, b1=b1, w2=w2, b2=b2, w3=w3, b3=b3, scale3=scale3,
        w1col_bf16=w1col.astype(jnp.bfloat16),
        w2mat_bf16=w2mat.astype(jnp.bfloat16),
        w3taps_bf16=w3taps_full.astype(jnp.bfloat16),
        b1_row=b1.reshape(1, F), b2_row=b2.reshape(1, F),
        b3_row=b3_full, scale3_row=scale3_full,
    )


def flow_forward(x_nchw, params):
    """Flow.forward. Input/output in NCHW (PyTorch convention)."""
    N, C, H, W = x_nchw.shape
    Cin = C // 2
    M = N * H * W
    x = jnp.transpose(x_nchw, (0, 2, 3, 1)).astype(jnp.float32)       # NHWC
    x2d = x.reshape(M, C)

    # ActNorm statistics: tiny per-channel reduction -> XLA (two-pass unbiased
    # std, matching torch.std(unbiased=True)).  Keep stats / log-det in f32.
    mean = jnp.mean(x2d, axis=0, keepdims=True)                       # (1, C)
    std = jnp.sqrt(jnp.sum((x2d - mean) ** 2, axis=0, keepdims=True) / (M - 1))
    s = 1.0 / (std + 1e-6)
    # log_det = h*w*sum(log|s|) + h*w*sum(S);  aff_det == 0
    log_det = H * W * (jnp.sum(jnp.log(jnp.abs(s))) + jnp.sum(params["S_log"]))

    # Kernel A: tiled normalize + invertible 1x1 conv
    y2d = actnorm_invconv(x2d, s, mean, params["w_inv_T"])            # (M, C)
    y3 = y2d.reshape(N, H, W, C)

    # Head conv im2col over x_a only (zero padding; small 9*Cin expansion).
    x_a = y3[..., :Cin]
    xa_pad = jnp.pad(x_a, ((0, 0), (1, 1), (1, 1), (0, 0)))
    cols1 = im2col3x3(xa_pad, H, W).astype(jnp.bfloat16)              # (N,HW,9Cin)

    # Kernel BC: fused coupling net; output is already the concat (x_a | out_b)
    out3 = coupling_net(cols1, params["w1col_bf16"], params["b1_row"],
                        params["w2mat_bf16"], params["b2_row"],
                        params["w3taps_bf16"], params["b3_row"],
                        params["scale3_row"],
                        y2d.reshape(N, H * W, C), H, W)               # (N,HW,C)

    y_out = out3.reshape(N, H, W, C)
    return jnp.transpose(y_out, (0, 3, 1, 2)), log_det


# ----------------------------------------------------------------------------
# Pure-JAX reference (mirrors the PyTorch forward exactly, NCHW)
# ----------------------------------------------------------------------------
def reference_flow(x, params):
    N, C, H, W = x.shape
    dn = ("NCHW", "OIHW", "NCHW")
    # ActNorm
    flat = jnp.transpose(x, (1, 0, 2, 3)).reshape(C, -1)
    mean = jnp.mean(flat, axis=1).reshape(1, C, 1, 1)
    std = jnp.std(flat, axis=1, ddof=1).reshape(1, C, 1, 1)
    s = 1.0 / (std + 1e-6)
    y = s * (x - mean)
    ld = H * W * jnp.sum(jnp.log(jnp.abs(s)))
    # InvertibleConv
    y = lax.conv_general_dilated(y, params["w_inv"][:, :, None, None],
                                 (1, 1), "VALID", dimension_numbers=dn)
    ld = ld + H * W * jnp.sum(params["S_log"])
    # AffineCoupling
    Cin = C // 2
    x_a, x_b = y[:, :Cin], y[:, Cin:]
    h = lax.conv_general_dilated(x_a, params["w1"], (1, 1), ((1, 1), (1, 1)),
                                 dimension_numbers=dn) + params["b1"].reshape(1, -1, 1, 1)
    h = jnp.maximum(h, 0.0)
    h = lax.conv_general_dilated(h, params["w2"], (1, 1), "VALID",
                                 dimension_numbers=dn) + params["b2"].reshape(1, -1, 1, 1)
    h = jnp.maximum(h, 0.0)
    hp = jnp.pad(h, ((0, 0), (0, 0), (1, 1), (1, 1)), constant_values=1.0)
    net = lax.conv_general_dilated(hp, params["w3"], (1, 1), "VALID",
                                   dimension_numbers=dn) + params["b3"].reshape(1, -1, 1, 1)
    net = net * jnp.exp(params["scale3"].reshape(1, -1, 1, 1) * 3.0)
    out = jnp.concatenate([x_a, x_b + net], axis=1)
    return out, ld


if __name__ == "__main__":
    import numpy as np

    N, C, H, W = 2, 8, 8, 8            # small shapes; in_channel must be even
    F = 512                            # AffineCoupling default filter_size

    root = jax.random.PRNGKey(0)
    k_params, k_x = jax.random.split(root)
    params = make_params(C, F, k_params)
    x = jax.random.normal(k_x, (N, C, H, W), jnp.float32)

    y, log_det = flow_forward(x, params)
    jax.block_until_ready(y)
    jax.block_until_ready(log_det)

    y_ref, ld_ref = reference_flow(x, params)
    np.testing.assert_allclose(np.asarray(y), np.asarray(y_ref), rtol=1e-2, atol=1e-2)
    np.testing.assert_allclose(float(log_det), float(ld_ref), rtol=1e-3, atol=1e-3)

    print("KERNEL_OK")
</pallas_src>

<mosaic_0001>
module attributes {stable_mosaic.version = 11 : i64} {
  func.func @actnorm_invconv_kernel(%arg0: i32, %arg1: memref<128x8xf32, #tpu.memory_space<vmem>>, %arg2: memref<1x8xf32, #tpu.memory_space<vmem>>, %arg3: memref<1x8xf32, #tpu.memory_space<vmem>>, %arg4: memref<8x8xf32, #tpu.memory_space<vmem>>, %arg5: memref<128x8xf32, #tpu.memory_space<vmem>>) attributes {dimension_semantics = [#tpu.dimension_semantics<parallel>], iteration_bounds = array<i64: 1>, scalar_prefetch = 0 : i64, scratch_operands = 0 : i64, tpu.core_type = #tpu.core_type<tc>, window_params = [{transform_indices = @transform_0, window_bounds = array<i64: 128, 8>}, {pipeline_mode = #tpu.pipeline_mode<synchronous>, transform_indices = @transform_1, window_bounds = array<i64: 1, 8>}, {pipeline_mode = #tpu.pipeline_mode<synchronous>, transform_indices = @transform_2, window_bounds = array<i64: 1, 8>}, {pipeline_mode = #tpu.pipeline_mode<synchronous>, transform_indices = @transform_3, window_bounds = array<i64: 8, 8>}, {transform_indices = @transform_4, window_bounds = array<i64: 128, 8>}]} {
    %c0 = arith.constant 0 : index
    %c0_0 = arith.constant 0 : index
    %0 = vector.load %arg1[%c0, %c0_0] : memref<128x8xf32, #tpu.memory_space<vmem>>, vector<128x8xf32>
    %c0_1 = arith.constant 0 : index
    %c0_2 = arith.constant 0 : index
    %1 = vector.load %arg3[%c0_1, %c0_2] : memref<1x8xf32, #tpu.memory_space<vmem>>, vector<1x8xf32>
    %2 = vector.broadcast %1 : vector<1x8xf32> to vector<128x8xf32>
    %3 = arith.subf %0, %2 : vector<128x8xf32>
    %c0_3 = arith.constant 0 : index
    %c0_4 = arith.constant 0 : index
    %4 = vector.load %arg2[%c0_3, %c0_4] : memref<1x8xf32, #tpu.memory_space<vmem>>, vector<1x8xf32>
    %5 = vector.broadcast %4 : vector<1x8xf32> to vector<128x8xf32>
    %6 = arith.mulf %3, %5 : vector<128x8xf32>
    %c0_5 = arith.constant 0 : index
    %c0_6 = arith.constant 0 : index
    %7 = vector.load %arg4[%c0_5, %c0_6] : memref<8x8xf32, #tpu.memory_space<vmem>>, vector<8x8xf32>
    %cst = arith.constant dense<0.000000e+00> : vector<128x8xf32>
    %8 = tpu.matmul %6, %7, %cst {dimension_numbers = #tpu.dot_dimension_numbers<[1], [0], [0], [1], [0, 0, 1, 1], [], []>} : vector<128x8xf32>, vector<8x8xf32>, vector<128x8xf32> -> vector<128x8xf32>
    %c0_7 = arith.constant 0 : index
    %c0_8 = arith.constant 0 : index
    %9 = vector.load %arg5[%c0_7, %c0_8] : memref<128x8xf32, #tpu.memory_space<vmem>>, vector<128x8xf32>
    tpu.vector_store %arg5[%c0_7, %c0_8], %8 {strides = array<i32>} : memref<128x8xf32, #tpu.memory_space<vmem>>, vector<128x8xf32>,
    return
  }
  func.func @transform_0(%arg0: i32) -> (i32, i32) {
    %c0_i32 = arith.constant 0 : i32
    %c0_i32_0 = arith.constant 0 : i32
    return %arg0, %c0_i32 : i32, i32
  }
  func.func @transform_1(%arg0: i32) -> (i32, i32) {
    %c0_i32 = arith.constant 0 : i32
    %c0_i32_0 = arith.constant 0 : i32
    %c0_i32_1 = arith.constant 0 : i32
    return %c0_i32, %c0_i32_0 : i32, i32
  }
  func.func @transform_2(%arg0: i32) -> (i32, i32) {
    %c0_i32 = arith.constant 0 : i32
    %c0_i32_0 = arith.constant 0 : i32
    %c0_i32_1 = arith.constant 0 : i32
    return %c0_i32, %c0_i32_0 : i32, i32
  }
  func.func @transform_3(%arg0: i32) -> (i32, i32) {
    %c0_i32 = arith.constant 0 : i32
    %c0_i32_0 = arith.constant 0 : i32
    %c0_i32_1 = arith.constant 0 : i32
    return %c0_i32, %c0_i32_0 : i32, i32
  }
  func.func @transform_4(%arg0: i32) -> (i32, i32) {
    %c0_i32 = arith.constant 0 : i32
    %c0_i32_0 = arith.constant 0 : i32
    return %arg0, %c0_i32 : i32, i32
  }
}

</mosaic_0001>

<bundles_post_ra>
// kernel: tpu_custom_call.1
= control target key start
LH: loop header
LB: loop body
LE: loop exit
PB: predicated region body
PF: predicated region fallthrough
CT: control target
= control target key end

     0   :  { %vm74_vm0 = vcmask 64512   ;;  %s409_s3 = inlined_call_operand.vmem [shape: f32[8,8], index: 3, kind: input, shape index: {}]   ;;  %s410_s0 = inlined_call_operand.vmem [shape: f32[128,8], index: 0, kind: input, shape index: {}]   ;;  %s411_s1 = inlined_call_operand.vmem [shape: f32[1,8], index: 1, kind: input, shape index: {}]   ;;  %s412_s2 = inlined_call_operand.vmem [shape: f32[1,8], index: 2, kind: input, shape index: {}]   ;;  %s413_s4 = inlined_call_operand.vmem [shape: f32[128,8], index: 4, kind: output, shape index: {}]  }
   0x1   :  { %v73_v0 = vld [vmem:[%s409_s3] sm:$0xff]  ;;  %v26_v11 = vld [vmem:[%s410_s0 + $0x48] sm:$0xff]  ;;  %v27_v27 = vld [vmem:[%s410_s0 + $0x50] sm:$0xff] }
   0x2   :  { %v25_v1 = vld [vmem:[%s410_s0 + $0x40] sm:$0xff]  ;;  %225 = vmatpush.msra.mxu2 %v73_v0  ;;  %226 = vmatpush.msra.mxu3 %v73_v0  ;;  %v30_v12 = vld [vmem:[%s410_s0 + $0x68] sm:$0xff]  ;;  %v31_v28 = vld [vmem:[%s410_s0 + $0x70] sm:$0xff] }
   0x3   :  { %v263_v2 = vld [vmem:[%s412_s2] ss:$0 sm:$0xff]  ;;  %138 = vmatpush.msra.mxu0 %v73_v0  ;;  %224 = vmatpush.msra.mxu1 %v73_v0  ;;  %v18_v17 = vld [vmem:[%s410_s0 + $0x8] sm:$0xff]  ;;  %v19_v29 = vld [vmem:[%s410_s0 + $0x10] sm:$0xff] }
   0x4   :  { %v228_v3 = vld [vmem:[%s411_s1] ss:$0 sm:$0xff]  ;;  %v45_v7 = vsub.f32 %v25_v1, %v263_v2  ;;  %v22_v18 = vld [vmem:[%s410_s0 + $0x28] sm:$0xff]  ;;  %v46_v19 = vsub.f32 %v26_v11, %v263_v2  ;;  %v50_v20 = vsub.f32 %v30_v12, %v263_v2  ;;  %v38_v21 = vsub.f32 %v18_v17, %v263_v2  ;;  %v23_v30 = vld [vmem:[%s410_s0 + $0x30] sm:$0xff] }
   0x5   :  { %v29_v4 = vld [vmem:[%s410_s0 + $0x60] sm:$0xff]  ;;  %v42_v22 = vsub.f32 %v22_v18, %v263_v2  ;;  %v47_v31 = vsub.f32 %v27_v27, %v263_v2  ;;  %v51_v32 = vsub.f32 %v31_v28, %v263_v2  ;;  %v39_v33 = vsub.f32 %v19_v29, %v263_v2  ;;  %v28_v39 = vld [vmem:[%s410_s0 + $0x58] sm:$0xff] }
   0x6   :  { %v17_v5 = vld [vmem:[%s410_s0] sm:$0xff]  ;;  %v49_v8 = vsub.f32 %v29_v4, %v263_v2  ;;  %v65_v13 = vmul.f32 %v228_v3, %v45_v7  ;;  %v66_v23 = vmul.f32 %v228_v3, %v46_v19  ;;  %v70_v24 = vmul.f32 %v228_v3, %v50_v20  ;;  %v32_v40 = vld [vmem:[%s410_s0 + $0x78] sm:$0xff] }
   0x7   :  { %v21_v6 = vld [vmem:[%s410_s0 + $0x20] sm:$0xff]  ;;  %v37_v9 = vsub.f32 %v17_v5, %v263_v2  ;;  %v58_v25 = vmul.f32 %v228_v3, %v38_v21  ;;  %v62_v26 = vmul.f32 %v228_v3, %v42_v22  ;;  %v43_v34 = vsub.f32 %v23_v30, %v263_v2  ;;  %v20_v41 = vld [vmem:[%s410_s0 + $0x18] sm:$0xff] }
   0x8   :  { %v41_v10 = vsub.f32 %v21_v6, %v263_v2  ;;  %v69_v14 = vmul.f32 %v228_v3, %v49_v8  ;;  %216 = vmatmul.msk.f32.vlgmr.msra.gmra.mxu2 %vm74_vm0, %v65_v13  ;;  %v67_v35 = vmul.f32 %v228_v3, %v47_v31  ;;  %v71_v36 = vmul.f32 %v228_v3, %v51_v32  ;;  %v24_v42 = vld [vmem:[%s410_s0 + $0x38] sm:$0xff] }
   0x9   :  { %v57_v15 = vmul.f32 %v228_v3, %v37_v9  ;;  %v59_v37 = vmul.f32 %v228_v3, %v39_v33  ;;  %v63_v38 = vmul.f32 %v228_v3, %v43_v34  ;;  %v48_v43 = vsub.f32 %v28_v39, %v263_v2 }
   0xa   :  { %v61_v16 = vmul.f32 %v228_v3, %v41_v10  ;;  %220 = vmatmul.msk.f32.vlgmr.msra.gmra.mxu3 %vm74_vm0, %v69_v14  ;;  %v52_v44 = vsub.f32 %v32_v40, %v263_v2  ;;  %v40_v45 = vsub.f32 %v20_v41, %v263_v2  ;;  %v44_v46 = vsub.f32 %v24_v42, %v263_v2 }
   0xb   :  { %208 = vmatmul.msk.f32.vlgmr.msra.gmra.mxu0 %vm74_vm0, %v57_v15  ;;  %v68_v47 = vmul.f32 %v228_v3, %v48_v43 }
   0xc   :  { %212 = vmatmul.msk.f32.vlgmr.msra.gmra.mxu1 %vm74_vm0, %v61_v16  ;;  %v72_v48 = vmul.f32 %v228_v3, %v52_v44  ;;  %v60_v49 = vmul.f32 %v228_v3, %v40_v45  ;;  %v64_v50 = vmul.f32 %v228_v3, %v44_v46 }
  0x10   :  { %217 = vmatmul.msk.f32.gmra.mxu2 %vm74_vm0, %v66_v23 }
  0x12   :  { %221 = vmatmul.msk.f32.gmra.mxu3 %vm74_vm0, %v70_v24 }
  0x13   :  { %209 = vmatmul.msk.f32.gmra.mxu0 %vm74_vm0, %v58_v25 }
  0x14   :  { %213 = vmatmul.msk.f32.gmra.mxu1 %vm74_vm0, %v62_v26 }
  0x18   :  { %218 = vmatmul.msk.f32.gmra.mxu2 %vm74_vm0, %v67_v35 }
  0x1a   :  { %222 = vmatmul.msk.f32.gmra.mxu3 %vm74_vm0, %v71_v36 }
  0x1b   :  { %210 = vmatmul.msk.f32.gmra.mxu0 %vm74_vm0, %v59_v37 }
  0x1c   :  { %214 = vmatmul.msk.f32.gmra.mxu1 %vm74_vm0, %v63_v38 }
  0x20   :  { %219 = vmatmul.msk.f32.gmra.mxu2 %vm74_vm0, %v68_v47 }
  0x22   :  { %223 = vmatmul.msk.f32.gmra.mxu3 %vm74_vm0, %v72_v48 }
  0x23   :  { %211 = vmatmul.msk.f32.gmra.mxu0 %vm74_vm0, %v60_v49 }
  0x24   :  { %215 = vmatmul.msk.f32.gmra.mxu1 %vm74_vm0, %v64_v50 }
  0x88   :  { %v140_v51 = vpop.f32.mrf.mxu0 }
  0x89   :  { %v152_v52 = vpop.f32.mrf.mxu1  ;;  %188 = vst.msk [vmem:[%s413_s4] sm:$0xff] %vm74_vm0, %v140_v51 }
  0x8a   :  { %192 = vst.msk [vmem:[%s413_s4 + $0x20] sm:$0xff] %vm74_vm0, %v152_v52 }
  0x8b   :  { %v164_v53 = vpop.f32.mrf.mxu2 }
  0x8c   :  { %196 = vst.msk [vmem:[%s413_s4 + $0x40] sm:$0xff] %vm74_vm0, %v164_v53 }
  0x8d   :  { %v176_v54 = vpop.f32.mrf.mxu3 }
  0x8e   :  { %200 = vst.msk [vmem:[%s413_s4 + $0x60] sm:$0xff] %vm74_vm0, %v176_v54 }
  0x90   :  { %v143_v55 = vpop.f32.mrf.mxu0 }
  0x91   :  { %v155_v56 = vpop.f32.mrf.mxu1  ;;  %189 = vst.msk [vmem:[%s413_s4 + $0x8] sm:$0xff] %vm74_vm0, %v143_v55 }
  0x92   :  { %193 = vst.msk [vmem:[%s413_s4 + $0x28] sm:$0xff] %vm74_vm0, %v155_v56 }
  0x93   :  { %v167_v57 = vpop.f32.mrf.mxu2 }
  0x94   :  { %197 = vst.msk [vmem:[%s413_s4 + $0x48] sm:$0xff] %vm74_vm0, %v167_v57 }
  0x95   :  { %v179_v58 = vpop.f32.mrf.mxu3 }
  0x96   :  { %201 = vst.msk [vmem:[%s413_s4 + $0x68] sm:$0xff] %vm74_vm0, %v179_v58 }
  0x98   :  { %v146_v59 = vpop.f32.mrf.mxu0 }
  0x99   :  { %v158_v60 = vpop.f32.mrf.mxu1  ;;  %190 = vst.msk [vmem:[%s413_s4 + $0x10] sm:$0xff] %vm74_vm0, %v146_v59 }
  0x9a   :  { %194 = vst.msk [vmem:[%s413_s4 + $0x30] sm:$0xff] %vm74_vm0, %v158_v60 }
  0x9b   :  { %v170_v61 = vpop.f32.mrf.mxu2 }
  0x9c   :  { %198 = vst.msk [vmem:[%s413_s4 + $0x50] sm:$0xff] %vm74_vm0, %v170_v61 }
  0x9d   :  { %v182_v62 = vpop.f32.mrf.mxu3 }
  0x9e   :  { %202 = vst.msk [vmem:[%s413_s4 + $0x70] sm:$0xff] %vm74_vm0, %v182_v62 }
  0xa0   :  { %v149_v63 = vpop.f32.mrf.mxu0 }
  0xa1   :  { %v161_v0 = vpop.f32.mrf.mxu1  ;;  %191 = vst.msk [vmem:[%s413_s4 + $0x18] sm:$0xff] %vm74_vm0, %v149_v63 }
  0xa2   :  { %195 = vst.msk [vmem:[%s413_s4 + $0x38] sm:$0xff] %vm74_vm0, %v161_v0 }
  0xa3   :  { %v173_v1 = vpop.f32.mrf.mxu2 }
  0xa4   :  { %199 = vst.msk [vmem:[%s413_s4 + $0x58] sm:$0xff] %vm74_vm0, %v173_v1 }
  0xa5   :  { %v185_v2 = vpop.f32.mrf.mxu3 }
  0xa6   :  { %203 = vst.msk [vmem:[%s413_s4 + $0x78] sm:$0xff] %vm74_vm0, %v185_v2 }

</bundles_post_ra>
